<compile_context>
chip_gen: v7x
topology: tpu7x:2x2x1
jax: 0.10.0
libtpu: 0.0.40
codegen_flags: <defaults>
</compile_context>

<pallas_src>
import functools

import jax
import jax.numpy as jnp
from jax import lax
from jax.experimental import pallas as pl
from jax.experimental.pallas import tpu as pltpu

BN_EPS = 0.2          # BatchNorm1d(eps=0.2)
LEAKY_SLOPE = 0.2     # GATConv default negative_slope
RADIUS = 4.0          # radius_graph(r=4)
OUT_PAD = 128         # lane-dense padded width of the final output slab
BP = 8                # graphs padded to 8 sublanes for the pooled stages
POS_PAD = 8           # pos coords padded to 8 lanes


def _vmem_spec():
    return pl.BlockSpec(memory_space=pltpu.MemorySpace.VMEM)


# ------------------------------ fused kernel --------------------------------

def fused_gat_kernel(x_ref, pos_ref, oh_ref,
                     w01_ref, g1_ref, b1_ref, m1_ref, v1_ref,
                     wg_ref, asrc_ref, adst_ref, gb_ref,
                     w2_ref, g2_ref, b2_ref, m2_ref, v2_ref,
                     w3_ref, b3_ref, out_ref):
    f32 = jnp.float32
    pos = pos_ref[...]          # [N, POS_PAD]  (zero-padded coords)
    onehot = oh_ref[...]        # [BP, N]       one-hot graph membership

    # --- radius_graph(r=4) within each graph (+ GATConv self-loops on diag) ---
    gram = lax.dot_general(pos, pos, (((1,), (1,)), ((), ())),
                           preferred_element_type=f32)              # [N, N]
    pp = pos * pos
    sq_col = jnp.sum(pp, axis=-1, keepdims=True)                    # [N, 1]
    ones_p = jnp.ones((1, pos.shape[1]), f32)
    sq_row = lax.dot_general(ones_p, pp, (((1,), (1,)), ((), ())),
                             preferred_element_type=f32)            # [1, N]
    d2 = sq_col + sq_row - 2.0 * gram                                # ||pi-pj||^2
    same = lax.dot_general(onehot, onehot, (((0,), (0,)), ((), ())),
                           preferred_element_type=f32)              # [N, N]
    edge_mask = (d2 <= RADIUS * RADIUS) & (same > 0.5)
    # TODO(synk): radius_graph's max_num_neighbors=32 cap not applied (N small).

    # --- lin01: Linear(no bias) -> ReLU -> BN(eval) -> Dropout(identity) ---
    h1 = jnp.dot(x_ref[...], w01_ref[...], preferred_element_type=f32)
    h1 = jnp.maximum(h1, 0.0)
    h1 = (h1 - m1_ref[...]) * lax.rsqrt(v1_ref[...] + BN_EPS) * g1_ref[...] \
        + b1_ref[...]

    # --- GATConv linear: lane-dense [N, H*D] (no [H,N,D] transposes) ---
    hg = jnp.dot(h1, wg_ref[...], preferred_element_type=f32)

    heads, D = asrc_ref.shape
    # TODO(synk): at full scale (heads=16, large N) make the head axis a grid
    #             dimension and tile the [N,N] scores flash-style with an
    #             online-softmax accumulator instead of this static unroll.
    head_outs = []
    for hd in range(heads):
        hh = hg[:, hd * D:(hd + 1) * D]                              # [N, D]
        adst = adst_ref[hd:hd + 1, :]                                # [1, D]
        asrc = asrc_ref[hd:hd + 1, :]                                # [1, D]
        # alpha_dst[i] = <h_i, a_dst>  -> column [N, 1]
        a_dst = jnp.sum(hh * adst, axis=-1, keepdims=True)
        # alpha_src[j] = <h_j, a_src>  -> row [1, N] via a single [1,D]x[D,N] dot
        a_src = lax.dot_general(asrc, hh, (((1,), (1,)), ((), ())),
                                preferred_element_type=f32)          # [1, N]
        e = a_dst + a_src                                            # e[i, j]
        e = jnp.where(e > 0, e, LEAKY_SLOPE * e)                     # LeakyReLU
        e = jnp.where(edge_mask, e, jnp.float32(-1e30))              # mask
        m = jnp.max(e, axis=1, keepdims=True)
        p = jnp.exp(e - m)                                           # masked -> 0
        denom = jnp.sum(p, axis=1, keepdims=True) + 1e-16            # PyG softmax
        attn = p * pl.reciprocal(denom, approx=True)                 # EUP slot
        head_outs.append(jnp.dot(attn, hh, preferred_element_type=f32))
    gat = jnp.concatenate(head_outs, axis=-1)                        # [N, H*D]
    gat = jnp.maximum(gat + gb_ref[...], 0.0)                        # bias + ReLU

    # --- GraphSizeNorm + global_mean_pool fused: out[b] = deg^{-1.5} * sum_i ---
    deg = jnp.sum(onehot, axis=1, keepdims=True)                     # [BP, 1]
    deg_safe = jnp.maximum(deg, 1.0)
    scale = jnp.where(deg > 0.5, lax.rsqrt(deg_safe) / deg_safe, 0.0)
    pooled = jnp.dot(onehot, gat, preferred_element_type=f32) * scale

    # --- lin2: Dropout(identity) -> Linear(no bias) -> ReLU -> BN(eval) ---
    h2 = jnp.dot(pooled, w2_ref[...], preferred_element_type=f32)
    h2 = jnp.maximum(h2, 0.0)
    h2 = (h2 - m2_ref[...]) * lax.rsqrt(v2_ref[...] + BN_EPS) * g2_ref[...] \
        + b2_ref[...]

    # --- lin3: Linear + bias into a lane-dense (BP, 128) slab ---
    out_ref[...] = jnp.dot(h2, w3_ref[...], preferred_element_type=f32) \
        + b3_ref[...]


# ----------------------------- parameter init -------------------------------

def init_params(key, in_features, hidden1, heads, head_dim, hidden2, out_dim):
    ks = jax.random.split(key, 8)
    f32 = jnp.float32
    p = {}
    # lin01: Linear(in, hidden1, bias=False) + ReLU + BN(hidden1, eps=0.2)
    p["w01"] = jax.random.normal(ks[0], (in_features, hidden1), f32) * 0.1
    p["bn1_g"] = jnp.ones((1, hidden1), f32)
    p["bn1_b"] = jnp.zeros((1, hidden1), f32)
    p["bn1_m"] = jnp.zeros((1, hidden1), f32)
    p["bn1_v"] = jnp.ones((1, hidden1), f32)
    # GATConv(hidden1, head_dim, heads): lin (no bias), att_src/dst, bias
    p["w_gat"] = jax.random.normal(ks[1], (hidden1, heads * head_dim), f32) * 0.1
    p["att_src"] = jax.random.normal(ks[2], (heads, head_dim), f32) * 0.1
    p["att_dst"] = jax.random.normal(ks[3], (heads, head_dim), f32) * 0.1
    p["gat_bias"] = jax.random.normal(ks[4], (1, heads * head_dim), f32) * 0.1
    # lin2: Dropout + Linear(heads*head_dim, hidden2, bias=False) + ReLU + BN
    p["w2"] = jax.random.normal(ks[5], (heads * head_dim, hidden2), f32) * 0.1
    p["bn2_g"] = jnp.ones((1, hidden2), f32)
    p["bn2_b"] = jnp.zeros((1, hidden2), f32)
    p["bn2_m"] = jnp.zeros((1, hidden2), f32)
    p["bn2_v"] = jnp.ones((1, hidden2), f32)
    # lin3: Linear(hidden2, out_dim) with bias
    p["w3"] = jax.random.normal(ks[6], (hidden2, out_dim), f32) * 0.1
    p["b3"] = jax.random.normal(ks[7], (1, out_dim), f32) * 0.1
    return p


# --------------------------------- forward ----------------------------------

@functools.partial(jax.jit, static_argnames=("heads", "head_dim", "num_graphs"))
def gat_x1_gmp_forward(x, pos, batch, params, heads, head_dim, num_graphs):
    f32 = jnp.float32
    out_dim = params["w3"].shape[1]

    # Tiny one-time prep under the same jit (feeds the single fused kernel):
    pos_p = jnp.pad(pos.astype(f32),
                    ((0, 0), (0, max(0, POS_PAD - pos.shape[1]))))
    onehot = (batch[None, :] ==
              jnp.arange(BP, dtype=batch.dtype)[:, None]).astype(f32)  # [BP, N]
    w3p = jnp.pad(params["w3"], ((0, 0), (0, OUT_PAD - out_dim)))
    b3p = jnp.pad(params["b3"], ((0, 0), (0, OUT_PAD - out_dim)))

    out_pad = pl.pallas_call(
        fused_gat_kernel,
        out_shape=jax.ShapeDtypeStruct((BP, OUT_PAD), f32),
        in_specs=[_vmem_spec()] * 19,
        out_specs=_vmem_spec(),
    )(x, pos_p, onehot,
      params["w01"], params["bn1_g"], params["bn1_b"],
      params["bn1_m"], params["bn1_v"],
      params["w_gat"], params["att_src"], params["att_dst"], params["gat_bias"],
      params["w2"], params["bn2_g"], params["bn2_b"],
      params["bn2_m"], params["bn2_v"],
      w3p, b3p)

    return {"A2": out_pad[:num_graphs, :out_dim]}


# ----------------------------------- main ------------------------------------

if __name__ == "__main__":
    # Small, module-consistent shapes.
    N = 16            # total nodes
    B = 2             # graphs in the batch (must be <= BP)
    IN_F = 32         # data.x feature dim (scaled down from 16928)
    HID1 = 64         # lin01 output (scaled down from 2048)
    HEADS = 4         # GAT heads (scaled down from 16)
    HEAD_D = 16       # GAT per-head dim (scaled down from 128); concat -> 64
    HID2 = 32         # lin2 output (scaled down from 1024)
    OUT = 10          # lin3 output

    key = jax.random.PRNGKey(0)
    kx, kp, kparam = jax.random.split(key, 3)

    x = jax.random.normal(kx, (N, IN_F), jnp.float32)           # data.x
    pos = jax.random.uniform(kp, (N, 3), jnp.float32) * 6.0     # data.pos
    batch = jnp.repeat(jnp.arange(B, dtype=jnp.int32), N // B)  # data.batch

    params = init_params(kparam, IN_F, HID1, HEADS, HEAD_D, HID2, OUT)

    result = gat_x1_gmp_forward(x, pos, batch, params,
                                heads=HEADS, head_dim=HEAD_D, num_graphs=B)
    jax.block_until_ready(result["A2"])
    assert result["A2"].shape == (B, OUT)
    print("KERNEL_OK")
</pallas_src>

<mosaic_0001>
module attributes {stable_mosaic.version = 11 : i64} {
  func.func @fused_gat_kernel(%arg0: memref<16x32xf32, #tpu.memory_space<vmem>>, %arg1: memref<16x8xf32, #tpu.memory_space<vmem>>, %arg2: memref<8x16xf32, #tpu.memory_space<vmem>>, %arg3: memref<32x64xf32, #tpu.memory_space<vmem>>, %arg4: memref<1x64xf32, #tpu.memory_space<vmem>>, %arg5: memref<1x64xf32, #tpu.memory_space<vmem>>, %arg6: memref<1x64xf32, #tpu.memory_space<vmem>>, %arg7: memref<1x64xf32, #tpu.memory_space<vmem>>, %arg8: memref<64x64xf32, #tpu.memory_space<vmem>>, %arg9: memref<4x16xf32, #tpu.memory_space<vmem>>, %arg10: memref<4x16xf32, #tpu.memory_space<vmem>>, %arg11: memref<1x64xf32, #tpu.memory_space<vmem>>, %arg12: memref<64x32xf32, #tpu.memory_space<vmem>>, %arg13: memref<1x32xf32, #tpu.memory_space<vmem>>, %arg14: memref<1x32xf32, #tpu.memory_space<vmem>>, %arg15: memref<1x32xf32, #tpu.memory_space<vmem>>, %arg16: memref<1x32xf32, #tpu.memory_space<vmem>>, %arg17: memref<32x128xf32, #tpu.memory_space<vmem>>, %arg18: memref<1x128xf32, #tpu.memory_space<vmem>>, %arg19: memref<8x128xf32, #tpu.memory_space<vmem>>) attributes {dimension_semantics = [], scalar_prefetch = 0 : i64, scratch_operands = 0 : i64, tpu.core_type = #tpu.core_type<tc>} {
    %c0 = arith.constant 0 : index
    %c0_0 = arith.constant 0 : index
    %0 = vector.load %arg1[%c0, %c0_0] : memref<16x8xf32, #tpu.memory_space<vmem>>, vector<16x8xf32>
    %c0_1 = arith.constant 0 : index
    %c0_2 = arith.constant 0 : index
    %1 = vector.load %arg2[%c0_1, %c0_2] : memref<8x16xf32, #tpu.memory_space<vmem>>, vector<8x16xf32>
    %cst = arith.constant dense<0.000000e+00> : vector<16x16xf32>
    %2 = tpu.matmul %0, %0, %cst {dimension_numbers = #tpu.dot_dimension_numbers<[1], [1], [0], [0], [0, 0, 1, 0], [], []>} : vector<16x8xf32>, vector<16x8xf32>, vector<16x16xf32> -> vector<16x16xf32>
    %3 = arith.mulf %0, %0 : vector<16x8xf32>
    %cst_3 = arith.constant dense<0.000000e+00> : vector<16xf32>
    %4 = vector.multi_reduction <add>, %3, %cst_3 [1] : vector<16x8xf32> to vector<16xf32>
    %5 = vector.shape_cast %4 : vector<16xf32> to vector<16x1xf32>
    %cst_4 = arith.constant 1.000000e+00 : f32
    %6 = vector.broadcast %cst_4 : f32 to vector<1x8xf32>
    %cst_5 = arith.constant dense<0.000000e+00> : vector<1x16xf32>
    %7 = tpu.matmul %6, %3, %cst_5 {dimension_numbers = #tpu.dot_dimension_numbers<[1], [1], [0], [0], [0, 0, 1, 0], [], []>} : vector<1x8xf32>, vector<16x8xf32>, vector<1x16xf32> -> vector<1x16xf32>
    %8 = vector.broadcast %5 : vector<16x1xf32> to vector<16x16xf32>
    %9 = vector.broadcast %7 : vector<1x16xf32> to vector<16x16xf32>
    %10 = arith.addf %8, %9 : vector<16x16xf32>
    %cst_6 = arith.constant 2.000000e+00 : f32
    %11 = vector.broadcast %cst_6 : f32 to vector<16x16xf32>
    %12 = arith.mulf %11, %2 : vector<16x16xf32>
    %13 = arith.subf %10, %12 : vector<16x16xf32>
    %cst_7 = arith.constant dense<0.000000e+00> : vector<16x16xf32>
    %14 = tpu.matmul %1, %1, %cst_7 {dimension_numbers = #tpu.dot_dimension_numbers<[0], [0], [1], [1], [0, 1, 1, 1], [], []>} : vector<8x16xf32>, vector<8x16xf32>, vector<16x16xf32> -> vector<16x16xf32>
    %cst_8 = arith.constant 1.600000e+01 : f32
    %15 = vector.broadcast %cst_8 : f32 to vector<16x16xf32>
    %16 = arith.cmpf ole, %13, %15 : vector<16x16xf32>
    %cst_9 = arith.constant 5.000000e-01 : f32
    %17 = vector.broadcast %cst_9 : f32 to vector<16x16xf32>
    %18 = arith.cmpf ogt, %14, %17 : vector<16x16xf32>
    %19 = arith.andi %16, %18 : vector<16x16xi1>
    %c0_10 = arith.constant 0 : index
    %c0_11 = arith.constant 0 : index
    %20 = vector.load %arg0[%c0_10, %c0_11] : memref<16x32xf32, #tpu.memory_space<vmem>>, vector<16x32xf32>
    %c0_12 = arith.constant 0 : index
    %c0_13 = arith.constant 0 : index
    %21 = vector.load %arg3[%c0_12, %c0_13] : memref<32x64xf32, #tpu.memory_space<vmem>>, vector<32x64xf32>
    %cst_14 = arith.constant dense<0.000000e+00> : vector<16x64xf32>
    %22 = tpu.matmul %20, %21, %cst_14 {dimension_numbers = #tpu.dot_dimension_numbers<[1], [0], [0], [1], [0, 0, 1, 1], [], []>} : vector<16x32xf32>, vector<32x64xf32>, vector<16x64xf32> -> vector<16x64xf32>
    %cst_15 = arith.constant 0.000000e+00 : f32
    %23 = vector.broadcast %cst_15 : f32 to vector<16x64xf32>
    %24 = arith.maximumf %22, %23 : vector<16x64xf32>
    %c0_16 = arith.constant 0 : index
    %c0_17 = arith.constant 0 : index
    %25 = vector.load %arg6[%c0_16, %c0_17] : memref<1x64xf32, #tpu.memory_space<vmem>>, vector<1x64xf32>
    %26 = vector.broadcast %25 : vector<1x64xf32> to vector<16x64xf32>
    %27 = arith.subf %24, %26 : vector<16x64xf32>
    %c0_18 = arith.constant 0 : index
    %c0_19 = arith.constant 0 : index
    %28 = vector.load %arg7[%c0_18, %c0_19] : memref<1x64xf32, #tpu.memory_space<vmem>>, vector<1x64xf32>
    %cst_20 = arith.constant 2.000000e-01 : f32
    %29 = vector.broadcast %cst_20 : f32 to vector<1x64xf32>
    %30 = arith.addf %28, %29 : vector<1x64xf32>
    %31 = math.rsqrt %30 : vector<1x64xf32>
    %32 = vector.broadcast %31 : vector<1x64xf32> to vector<16x64xf32>
    %33 = arith.mulf %27, %32 : vector<16x64xf32>
    %c0_21 = arith.constant 0 : index
    %c0_22 = arith.constant 0 : index
    %34 = vector.load %arg4[%c0_21, %c0_22] : memref<1x64xf32, #tpu.memory_space<vmem>>, vector<1x64xf32>
    %35 = vector.broadcast %34 : vector<1x64xf32> to vector<16x64xf32>
    %36 = arith.mulf %33, %35 : vector<16x64xf32>
    %c0_23 = arith.constant 0 : index
    %c0_24 = arith.constant 0 : index
    %37 = vector.load %arg5[%c0_23, %c0_24] : memref<1x64xf32, #tpu.memory_space<vmem>>, vector<1x64xf32>
    %38 = vector.broadcast %37 : vector<1x64xf32> to vector<16x64xf32>
    %39 = arith.addf %36, %38 : vector<16x64xf32>
    %c0_25 = arith.constant 0 : index
    %c0_26 = arith.constant 0 : index
    %40 = vector.load %arg8[%c0_25, %c0_26] : memref<64x64xf32, #tpu.memory_space<vmem>>, vector<64x64xf32>
    %cst_27 = arith.constant dense<0.000000e+00> : vector<16x64xf32>
    %41 = tpu.matmul %39, %40, %cst_27 {dimension_numbers = #tpu.dot_dimension_numbers<[1], [0], [0], [1], [0, 0, 1, 1], [], []>} : vector<16x64xf32>, vector<64x64xf32>, vector<16x64xf32> -> vector<16x64xf32>
    %42 = vector.extract_strided_slice %41 {offsets = [0, 0], sizes = [16, 16], strides = [1, 1]} : vector<16x64xf32> to vector<16x16xf32>
    %c0_28 = arith.constant 0 : index
    %c0_29 = arith.constant 0 : index
    %43 = vector.load %arg10[%c0_28, %c0_29] : memref<4x16xf32, #tpu.memory_space<vmem>>, vector<1x16xf32>
    %c0_30 = arith.constant 0 : index
    %c0_31 = arith.constant 0 : index
    %44 = vector.load %arg9[%c0_30, %c0_31] : memref<4x16xf32, #tpu.memory_space<vmem>>, vector<1x16xf32>
    %45 = vector.broadcast %43 : vector<1x16xf32> to vector<16x16xf32>
    %46 = arith.mulf %42, %45 : vector<16x16xf32>
    %cst_32 = arith.constant dense<0.000000e+00> : vector<16xf32>
    %47 = vector.multi_reduction <add>, %46, %cst_32 [1] : vector<16x16xf32> to vector<16xf32>
    %48 = vector.shape_cast %47 : vector<16xf32> to vector<16x1xf32>
    %cst_33 = arith.constant dense<0.000000e+00> : vector<1x16xf32>
    %49 = tpu.matmul %44, %42, %cst_33 {dimension_numbers = #tpu.dot_dimension_numbers<[1], [1], [0], [0], [0, 0, 1, 0], [], []>} : vector<1x16xf32>, vector<16x16xf32>, vector<1x16xf32> -> vector<1x16xf32>
    %50 = vector.broadcast %48 : vector<16x1xf32> to vector<16x16xf32>
    %51 = vector.broadcast %49 : vector<1x16xf32> to vector<16x16xf32>
    %52 = arith.addf %50, %51 : vector<16x16xf32>
    %cst_34 = arith.constant 0.000000e+00 : f32
    %53 = vector.broadcast %cst_34 : f32 to vector<16x16xf32>
    %54 = arith.cmpf ogt, %52, %53 : vector<16x16xf32>
    %cst_35 = arith.constant 2.000000e-01 : f32
    %55 = vector.broadcast %cst_35 : f32 to vector<16x16xf32>
    %56 = arith.mulf %55, %52 : vector<16x16xf32>
    %57 = arith.select %54, %52, %56 : vector<16x16xi1>, vector<16x16xf32>
    %cst_36 = arith.constant -1.000000e+30 : f32
    %58 = vector.broadcast %cst_36 : f32 to vector<16x16xf32>
    %59 = arith.select %19, %57, %58 : vector<16x16xi1>, vector<16x16xf32>
    %cst_37 = arith.constant dense<0xFF800000> : vector<16xf32>
    %60 = vector.multi_reduction <maximumf>, %59, %cst_37 [1] : vector<16x16xf32> to vector<16xf32>
    %61 = vector.shape_cast %60 : vector<16xf32> to vector<16x1xf32>
    %62 = vector.broadcast %61 : vector<16x1xf32> to vector<16x16xf32>
    %63 = arith.subf %59, %62 : vector<16x16xf32>
    %64 = math.exp %63 : vector<16x16xf32>
    %cst_38 = arith.constant dense<0.000000e+00> : vector<16xf32>
    %65 = vector.multi_reduction <add>, %64, %cst_38 [1] : vector<16x16xf32> to vector<16xf32>
    %66 = vector.shape_cast %65 : vector<16xf32> to vector<16x1xf32>
    %cst_39 = arith.constant 1.000000e-16 : f32
    %67 = vector.broadcast %cst_39 : f32 to vector<16x1xf32>
    %68 = arith.addf %66, %67 : vector<16x1xf32>
    %69 = tpu.reciprocal %68 {approx = true} : vector<16x1xf32> -> vector<16x1xf32>
    %70 = vector.broadcast %69 : vector<16x1xf32> to vector<16x16xf32>
    %71 = arith.mulf %64, %70 : vector<16x16xf32>
    %cst_40 = arith.constant dense<0.000000e+00> : vector<16x16xf32>
    %72 = tpu.matmul %71, %42, %cst_40 {dimension_numbers = #tpu.dot_dimension_numbers<[1], [0], [0], [1], [0, 0, 1, 1], [], []>} : vector<16x16xf32>, vector<16x16xf32>, vector<16x16xf32> -> vector<16x16xf32>
    %73 = vector.extract_strided_slice %41 {offsets = [0, 16], sizes = [16, 16], strides = [1, 1]} : vector<16x64xf32> to vector<16x16xf32>
    %c1 = arith.constant 1 : index
    %c0_41 = arith.constant 0 : index
    %74 = vector.load %arg10[%c1, %c0_41] : memref<4x16xf32, #tpu.memory_space<vmem>>, vector<1x16xf32>
    %c1_42 = arith.constant 1 : index
    %c0_43 = arith.constant 0 : index
    %75 = vector.load %arg9[%c1_42, %c0_43] : memref<4x16xf32, #tpu.memory_space<vmem>>, vector<1x16xf32>
    %76 = vector.broadcast %74 : vector<1x16xf32> to vector<16x16xf32>
    %77 = arith.mulf %73, %76 : vector<16x16xf32>
    %cst_44 = arith.constant dense<0.000000e+00> : vector<16xf32>
    %78 = vector.multi_reduction <add>, %77, %cst_44 [1] : vector<16x16xf32> to vector<16xf32>
    %79 = vector.shape_cast %78 : vector<16xf32> to vector<16x1xf32>
    %cst_45 = arith.constant dense<0.000000e+00> : vector<1x16xf32>
    %80 = tpu.matmul %75, %73, %cst_45 {dimension_numbers = #tpu.dot_dimension_numbers<[1], [1], [0], [0], [0, 0, 1, 0], [], []>} : vector<1x16xf32>, vector<16x16xf32>, vector<1x16xf32> -> vector<1x16xf32>
    %81 = vector.broadcast %79 : vector<16x1xf32> to vector<16x16xf32>
    %82 = vector.broadcast %80 : vector<1x16xf32> to vector<16x16xf32>
    %83 = arith.addf %81, %82 : vector<16x16xf32>
    %cst_46 = arith.constant 0.000000e+00 : f32
    %84 = vector.broadcast %cst_46 : f32 to vector<16x16xf32>
    %85 = arith.cmpf ogt, %83, %84 : vector<16x16xf32>
    %cst_47 = arith.constant 2.000000e-01 : f32
    %86 = vector.broadcast %cst_47 : f32 to vector<16x16xf32>
    %87 = arith.mulf %86, %83 : vector<16x16xf32>
    %88 = arith.select %85, %83, %87 : vector<16x16xi1>, vector<16x16xf32>
    %cst_48 = arith.constant -1.000000e+30 : f32
    %89 = vector.broadcast %cst_48 : f32 to vector<16x16xf32>
    %90 = arith.select %19, %88, %89 : vector<16x16xi1>, vector<16x16xf32>
    %cst_49 = arith.constant dense<0xFF800000> : vector<16xf32>
    %91 = vector.multi_reduction <maximumf>, %90, %cst_49 [1] : vector<16x16xf32> to vector<16xf32>
    %92 = vector.shape_cast %91 : vector<16xf32> to vector<16x1xf32>
    %93 = vector.broadcast %92 : vector<16x1xf32> to vector<16x16xf32>
    %94 = arith.subf %90, %93 : vector<16x16xf32>
    %95 = math.exp %94 : vector<16x16xf32>
    %cst_50 = arith.constant dense<0.000000e+00> : vector<16xf32>
    %96 = vector.multi_reduction <add>, %95, %cst_50 [1] : vector<16x16xf32> to vector<16xf32>
    %97 = vector.shape_cast %96 : vector<16xf32> to vector<16x1xf32>
    %cst_51 = arith.constant 1.000000e-16 : f32
    %98 = vector.broadcast %cst_51 : f32 to vector<16x1xf32>
    %99 = arith.addf %97, %98 : vector<16x1xf32>
    %100 = tpu.reciprocal %99 {approx = true} : vector<16x1xf32> -> vector<16x1xf32>
    %101 = vector.broadcast %100 : vector<16x1xf32> to vector<16x16xf32>
    %102 = arith.mulf %95, %101 : vector<16x16xf32>
    %cst_52 = arith.constant dense<0.000000e+00> : vector<16x16xf32>
    %103 = tpu.matmul %102, %73, %cst_52 {dimension_numbers = #tpu.dot_dimension_numbers<[1], [0], [0], [1], [0, 0, 1, 1], [], []>} : vector<16x16xf32>, vector<16x16xf32>, vector<16x16xf32> -> vector<16x16xf32>
    %104 = vector.extract_strided_slice %41 {offsets = [0, 32], sizes = [16, 16], strides = [1, 1]} : vector<16x64xf32> to vector<16x16xf32>
    %c2 = arith.constant 2 : index
    %c0_53 = arith.constant 0 : index
    %105 = vector.load %arg10[%c2, %c0_53] : memref<4x16xf32, #tpu.memory_space<vmem>>, vector<1x16xf32>
    %c2_54 = arith.constant 2 : index
    %c0_55 = arith.constant 0 : index
    %106 = vector.load %arg9[%c2_54, %c0_55] : memref<4x16xf32, #tpu.memory_space<vmem>>, vector<1x16xf32>
    %107 = vector.broadcast %105 : vector<1x16xf32> to vector<16x16xf32>
    %108 = arith.mulf %104, %107 : vector<16x16xf32>
    %cst_56 = arith.constant dense<0.000000e+00> : vector<16xf32>
    %109 = vector.multi_reduction <add>, %108, %cst_56 [1] : vector<16x16xf32> to vector<16xf32>
    %110 = vector.shape_cast %109 : vector<16xf32> to vector<16x1xf32>
    %cst_57 = arith.constant dense<0.000000e+00> : vector<1x16xf32>
    %111 = tpu.matmul %106, %104, %cst_57 {dimension_numbers = #tpu.dot_dimension_numbers<[1], [1], [0], [0], [0, 0, 1, 0], [], []>} : vector<1x16xf32>, vector<16x16xf32>, vector<1x16xf32> -> vector<1x16xf32>
    %112 = vector.broadcast %110 : vector<16x1xf32> to vector<16x16xf32>
    %113 = vector.broadcast %111 : vector<1x16xf32> to vector<16x16xf32>
    %114 = arith.addf %112, %113 : vector<16x16xf32>
    %cst_58 = arith.constant 0.000000e+00 : f32
    %115 = vector.broadcast %cst_58 : f32 to vector<16x16xf32>
    %116 = arith.cmpf ogt, %114, %115 : vector<16x16xf32>
    %cst_59 = arith.constant 2.000000e-01 : f32
    %117 = vector.broadcast %cst_59 : f32 to vector<16x16xf32>
    %118 = arith.mulf %117, %114 : vector<16x16xf32>
    %119 = arith.select %116, %114, %118 : vector<16x16xi1>, vector<16x16xf32>
    %cst_60 = arith.constant -1.000000e+30 : f32
    %120 = vector.broadcast %cst_60 : f32 to vector<16x16xf32>
    %121 = arith.select %19, %119, %120 : vector<16x16xi1>, vector<16x16xf32>
    %cst_61 = arith.constant dense<0xFF800000> : vector<16xf32>
    %122 = vector.multi_reduction <maximumf>, %121, %cst_61 [1] : vector<16x16xf32> to vector<16xf32>
    %123 = vector.shape_cast %122 : vector<16xf32> to vector<16x1xf32>
    %124 = vector.broadcast %123 : vector<16x1xf32> to vector<16x16xf32>
    %125 = arith.subf %121, %124 : vector<16x16xf32>
    %126 = math.exp %125 : vector<16x16xf32>
    %cst_62 = arith.constant dense<0.000000e+00> : vector<16xf32>
    %127 = vector.multi_reduction <add>, %126, %cst_62 [1] : vector<16x16xf32> to vector<16xf32>
    %128 = vector.shape_cast %127 : vector<16xf32> to vector<16x1xf32>
    %cst_63 = arith.constant 1.000000e-16 : f32
    %129 = vector.broadcast %cst_63 : f32 to vector<16x1xf32>
    %130 = arith.addf %128, %129 : vector<16x1xf32>
    %131 = tpu.reciprocal %130 {approx = true} : vector<16x1xf32> -> vector<16x1xf32>
    %132 = vector.broadcast %131 : vector<16x1xf32> to vector<16x16xf32>
    %133 = arith.mulf %126, %132 : vector<16x16xf32>
    %cst_64 = arith.constant dense<0.000000e+00> : vector<16x16xf32>
    %134 = tpu.matmul %133, %104, %cst_64 {dimension_numbers = #tpu.dot_dimension_numbers<[1], [0], [0], [1], [0, 0, 1, 1], [], []>} : vector<16x16xf32>, vector<16x16xf32>, vector<16x16xf32> -> vector<16x16xf32>
    %135 = vector.extract_strided_slice %41 {offsets = [0, 48], sizes = [16, 16], strides = [1, 1]} : vector<16x64xf32> to vector<16x16xf32>
    %c3 = arith.constant 3 : index
    %c0_65 = arith.constant 0 : index
    %136 = vector.load %arg10[%c3, %c0_65] : memref<4x16xf32, #tpu.memory_space<vmem>>, vector<1x16xf32>
    %c3_66 = arith.constant 3 : index
    %c0_67 = arith.constant 0 : index
    %137 = vector.load %arg9[%c3_66, %c0_67] : memref<4x16xf32, #tpu.memory_space<vmem>>, vector<1x16xf32>
    %138 = vector.broadcast %136 : vector<1x16xf32> to vector<16x16xf32>
    %139 = arith.mulf %135, %138 : vector<16x16xf32>
    %cst_68 = arith.constant dense<0.000000e+00> : vector<16xf32>
    %140 = vector.multi_reduction <add>, %139, %cst_68 [1] : vector<16x16xf32> to vector<16xf32>
    %141 = vector.shape_cast %140 : vector<16xf32> to vector<16x1xf32>
    %cst_69 = arith.constant dense<0.000000e+00> : vector<1x16xf32>
    %142 = tpu.matmul %137, %135, %cst_69 {dimension_numbers = #tpu.dot_dimension_numbers<[1], [1], [0], [0], [0, 0, 1, 0], [], []>} : vector<1x16xf32>, vector<16x16xf32>, vector<1x16xf32> -> vector<1x16xf32>
    %143 = vector.broadcast %141 : vector<16x1xf32> to vector<16x16xf32>
    %144 = vector.broadcast %142 : vector<1x16xf32> to vector<16x16xf32>
    %145 = arith.addf %143, %144 : vector<16x16xf32>
    %cst_70 = arith.constant 0.000000e+00 : f32
    %146 = vector.broadcast %cst_70 : f32 to vector<16x16xf32>
    %147 = arith.cmpf ogt, %145, %146 : vector<16x16xf32>
    %cst_71 = arith.constant 2.000000e-01 : f32
    %148 = vector.broadcast %cst_71 : f32 to vector<16x16xf32>
    %149 = arith.mulf %148, %145 : vector<16x16xf32>
    %150 = arith.select %147, %145, %149 : vector<16x16xi1>, vector<16x16xf32>
    %cst_72 = arith.constant -1.000000e+30 : f32
    %151 = vector.broadcast %cst_72 : f32 to vector<16x16xf32>
    %152 = arith.select %19, %150, %151 : vector<16x16xi1>, vector<16x16xf32>
    %cst_73 = arith.constant dense<0xFF800000> : vector<16xf32>
    %153 = vector.multi_reduction <maximumf>, %152, %cst_73 [1] : vector<16x16xf32> to vector<16xf32>
    %154 = vector.shape_cast %153 : vector<16xf32> to vector<16x1xf32>
    %155 = vector.broadcast %154 : vector<16x1xf32> to vector<16x16xf32>
    %156 = arith.subf %152, %155 : vector<16x16xf32>
    %157 = math.exp %156 : vector<16x16xf32>
    %cst_74 = arith.constant dense<0.000000e+00> : vector<16xf32>
    %158 = vector.multi_reduction <add>, %157, %cst_74 [1] : vector<16x16xf32> to vector<16xf32>
    %159 = vector.shape_cast %158 : vector<16xf32> to vector<16x1xf32>
    %cst_75 = arith.constant 1.000000e-16 : f32
    %160 = vector.broadcast %cst_75 : f32 to vector<16x1xf32>
    %161 = arith.addf %159, %160 : vector<16x1xf32>
    %162 = tpu.reciprocal %161 {approx = true} : vector<16x1xf32> -> vector<16x1xf32>
    %163 = vector.broadcast %162 : vector<16x1xf32> to vector<16x16xf32>
    %164 = arith.mulf %157, %163 : vector<16x16xf32>
    %cst_76 = arith.constant dense<0.000000e+00> : vector<16x16xf32>
    %165 = tpu.matmul %164, %135, %cst_76 {dimension_numbers = #tpu.dot_dimension_numbers<[1], [0], [0], [1], [0, 0, 1, 1], [], []>} : vector<16x16xf32>, vector<16x16xf32>, vector<16x16xf32> -> vector<16x16xf32>
    %166 = tpu.concatenate %72, %103, %134, %165 in 1 : vector<16x16xf32>, vector<16x16xf32>, vector<16x16xf32>, vector<16x16xf32> -> vector<16x64xf32>
    %c0_77 = arith.constant 0 : index
    %c0_78 = arith.constant 0 : index
    %167 = vector.load %arg11[%c0_77, %c0_78] : memref<1x64xf32, #tpu.memory_space<vmem>>, vector<1x64xf32>
    %168 = vector.broadcast %167 : vector<1x64xf32> to vector<16x64xf32>
    %169 = arith.addf %166, %168 : vector<16x64xf32>
    %cst_79 = arith.constant 0.000000e+00 : f32
    %170 = vector.broadcast %cst_79 : f32 to vector<16x64xf32>
    %171 = arith.maximumf %169, %170 : vector<16x64xf32>
    %cst_80 = arith.constant dense<0.000000e+00> : vector<8xf32>
    %172 = vector.multi_reduction <add>, %1, %cst_80 [1] : vector<8x16xf32> to vector<8xf32>
    %173 = vector.shape_cast %172 : vector<8xf32> to vector<8x1xf32>
    %cst_81 = arith.constant 1.000000e+00 : f32
    %174 = vector.broadcast %cst_81 : f32 to vector<8x1xf32>
    %175 = arith.maximumf %173, %174 : vector<8x1xf32>
    %cst_82 = arith.constant 5.000000e-01 : f32
    %176 = vector.broadcast %cst_82 : f32 to vector<8x1xf32>
    %177 = arith.cmpf ogt, %173, %176 : vector<8x1xf32>
    %178 = math.rsqrt %175 : vector<8x1xf32>
    %179 = arith.divf %178, %175 : vector<8x1xf32>
    %cst_83 = arith.constant 0.000000e+00 : f32
    %180 = vector.broadcast %cst_83 : f32 to vector<8x1xf32>
    %181 = arith.select %177, %179, %180 : vector<8x1xi1>, vector<8x1xf32>
    %cst_84 = arith.constant dense<0.000000e+00> : vector<8x64xf32>
    %182 = tpu.matmul %1, %171, %cst_84 {dimension_numbers = #tpu.dot_dimension_numbers<[1], [0], [0], [1], [0, 0, 1, 1], [], []>} : vector<8x16xf32>, vector<16x64xf32>, vector<8x64xf32> -> vector<8x64xf32>
    %183 = vector.broadcast %181 : vector<8x1xf32> to vector<8x64xf32>
    %184 = arith.mulf %182, %183 : vector<8x64xf32>
    %c0_85 = arith.constant 0 : index
    %c0_86 = arith.constant 0 : index
    %185 = vector.load %arg12[%c0_85, %c0_86] : memref<64x32xf32, #tpu.memory_space<vmem>>, vector<64x32xf32>
    %cst_87 = arith.constant dense<0.000000e+00> : vector<8x32xf32>
    %186 = tpu.matmul %184, %185, %cst_87 {dimension_numbers = #tpu.dot_dimension_numbers<[1], [0], [0], [1], [0, 0, 1, 1], [], []>} : vector<8x64xf32>, vector<64x32xf32>, vector<8x32xf32> -> vector<8x32xf32>
    %cst_88 = arith.constant 0.000000e+00 : f32
    %187 = vector.broadcast %cst_88 : f32 to vector<8x32xf32>
    %188 = arith.maximumf %186, %187 : vector<8x32xf32>
    %c0_89 = arith.constant 0 : index
    %c0_90 = arith.constant 0 : index
    %189 = vector.load %arg15[%c0_89, %c0_90] : memref<1x32xf32, #tpu.memory_space<vmem>>, vector<1x32xf32>
    %190 = vector.broadcast %189 : vector<1x32xf32> to vector<8x32xf32>
    %191 = arith.subf %188, %190 : vector<8x32xf32>
    %c0_91 = arith.constant 0 : index
    %c0_92 = arith.constant 0 : index
    %192 = vector.load %arg16[%c0_91, %c0_92] : memref<1x32xf32, #tpu.memory_space<vmem>>, vector<1x32xf32>
    %cst_93 = arith.constant 2.000000e-01 : f32
    %193 = vector.broadcast %cst_93 : f32 to vector<1x32xf32>
    %194 = arith.addf %192, %193 : vector<1x32xf32>
    %195 = math.rsqrt %194 : vector<1x32xf32>
    %196 = vector.broadcast %195 : vector<1x32xf32> to vector<8x32xf32>
    %197 = arith.mulf %191, %196 : vector<8x32xf32>
    %c0_94 = arith.constant 0 : index
    %c0_95 = arith.constant 0 : index
    %198 = vector.load %arg13[%c0_94, %c0_95] : memref<1x32xf32, #tpu.memory_space<vmem>>, vector<1x32xf32>
    %199 = vector.broadcast %198 : vector<1x32xf32> to vector<8x32xf32>
    %200 = arith.mulf %197, %199 : vector<8x32xf32>
    %c0_96 = arith.constant 0 : index
    %c0_97 = arith.constant 0 : index
    %201 = vector.load %arg14[%c0_96, %c0_97] : memref<1x32xf32, #tpu.memory_space<vmem>>, vector<1x32xf32>
    %202 = vector.broadcast %201 : vector<1x32xf32> to vector<8x32xf32>
    %203 = arith.addf %200, %202 : vector<8x32xf32>
    %c0_98 = arith.constant 0 : index
    %c0_99 = arith.constant 0 : index
    %204 = vector.load %arg17[%c0_98, %c0_99] : memref<32x128xf32, #tpu.memory_space<vmem>>, vector<32x128xf32>
    %cst_100 = arith.constant dense<0.000000e+00> : vector<8x128xf32>
    %205 = tpu.matmul %203, %204, %cst_100 {dimension_numbers = #tpu.dot_dimension_numbers<[1], [0], [0], [1], [0, 0, 1, 1], [], []>} : vector<8x32xf32>, vector<32x128xf32>, vector<8x128xf32> -> vector<8x128xf32>
    %c0_101 = arith.constant 0 : index
    %c0_102 = arith.constant 0 : index
    %206 = vector.load %arg18[%c0_101, %c0_102] : memref<1x128xf32, #tpu.memory_space<vmem>>, vector<1x128xf32>
    %207 = vector.broadcast %206 : vector<1x128xf32> to vector<8x128xf32>
    %208 = arith.addf %205, %207 : vector<8x128xf32>
    %c0_103 = arith.constant 0 : index
    %c0_104 = arith.constant 0 : index
    %209 = vector.load %arg19[%c0_103, %c0_104] : memref<8x128xf32, #tpu.memory_space<vmem>>, vector<8x128xf32>
    tpu.vector_store %arg19[%c0_103, %c0_104], %208 {strides = array<i32>} : memref<8x128xf32, #tpu.memory_space<vmem>>, vector<8x128xf32>,
    return
  }
}

</mosaic_0001>

<bundles_post_ra>
// kernel: gat_x1_gmp_forward.1
= control target key start
LH: loop header
LB: loop body
LE: loop exit
PB: predicated region body
PF: predicated region fallthrough
CT: control target
= control target key end

     0   :  { %vm65_vm0 = vcmask 64512   ;;  %v2221_v1 = vmov 0.0|0.0   ;;  %vm2222_vm1 = vmmov 0   ;;  %v2223_v4 = vmov 0.0   ;;  %s2227_s24 = smov 32   ;;  %s2228_s25 = smov 96   ;;  %s2687_s2 = inlined_call_operand.vmem [shape: f32[8,16], index: 2, kind: input, shape index: {}]   ;;  %s2688_s1 = inlined_call_operand.vmem [shape: f32[16,8], index: 1, kind: input, shape index: {}]   ;;  %s2689_s3 = inlined_call_operand.vmem [shape: f32[32,64], index: 3, kind: input, shape index: {}]   ;;  %s2690_s0 = inlined_call_operand.vmem [shape: f32[16,32], index: 0, kind: input, shape index: {}]   ;;  %s2691_s8 = inlined_call_operand.vmem [shape: f32[64,64], index: 8, kind: input, shape index: {}]   ;;  %s2692_s10 = inlined_call_operand.vmem [shape: f32[4,16], index: 10, kind: input, shape index: {}]   ;;  %s2693_s7 = inlined_call_operand.vmem [shape: f32[1,64], index: 7, kind: input, shape index: {}]   ;;  %s2694_s6 = inlined_call_operand.vmem [shape: f32[1,64], index: 6, kind: input, shape index: {}]   ;;  %s2695_s4 = inlined_call_operand.vmem [shape: f32[1,64], index: 4, kind: input, shape index: {}]   ;;  %s2696_s5 = inlined_call_operand.vmem [shape: f32[1,64], index: 5, kind: input, shape index: {}]   ;;  %s2697_s9 = inlined_call_operand.vmem [shape: f32[4,16], index: 9, kind: input, shape index: {}]   ;;  %s2698_s12 = inlined_call_operand.vmem [shape: f32[64,32], index: 12, kind: input, shape index: {}]   ;;  %s2699_s11 = inlined_call_operand.vmem [shape: f32[1,64], index: 11, kind: input, shape index: {}]   ;;  %s2700_s17 = inlined_call_operand.vmem [shape: f32[32,128], index: 17, kind: input, shape index: {}]   ;;  %s2701_s16 = inlined_call_operand.vmem [shape: f32[1,32], index: 16, kind: input, shape index: {}]   ;;  %s2702_s15 = inlined_call_operand.vmem [shape: f32[1,32], index: 15, kind: input, shape index: {}]   ;;  %s2703_s13 = inlined_call_operand.vmem [shape: f32[1,32], index: 13, kind: input, shape index: {}]   ;;  %s2704_s14 = inlined_call_operand.vmem [shape: f32[1,32], index: 14, kind: input, shape index: {}]   ;;  %s2705_s18 = inlined_call_operand.vmem [shape: f32[1,128], index: 18, kind: input, shape index: {}]   ;;  %s2706_s19 = inlined_call_operand.vmem [shape: f32[8,128], index: 19, kind: output, shape index: {}]  }
   0x1   :  { %2710 = sst [smem:[#allocation2_spill]] %s2687_s2  ;;  %2075 = vmatprep.subr.bf16.mxu1 %v2221_v1  ;;  %1938 = vmatprep.mubr.msk.f32.mxu1 %vm2222_vm1, %v2223_v4  ;;  %vm2070_vm2 = vmpackc.low %vm65_vm0, %vm65_vm0  ;;  %v2224_v11 = vmov 1.0   ;;  %vm369_vm3 = vcmask 261120   ;;  %v491_v20 = vld [vmem:[%s2691_s8] sm:$0xff]  ;;  %v492_v21 = vld [vmem:[%s2691_s8 + $0x8] sm:$0xff]  ;;  %v234_v39 = vlaneseq  ;;  %vm499_vm4 = vcmask 523264  }
   0x2   :  { %2711 = sst [smem:[#allocation3_spill]] %s2688_s1  ;;  %s2714_s20 = sld [smem:[#allocation2_spill]]  ;;  %v2087_v22 = vpack.c.bf16 %v492_v21, %v491_v20  ;;  %v493_v24 = vld [vmem:[%s2691_s8 + $0x10] sm:$0xff]  ;;  %v494_v25 = vld [vmem:[%s2691_s8 + $0x18] sm:$0xff]  ;;  %v495_v28 = vld [vmem:[%s2691_s8 + $0x20] sm:$0xff]  ;;  %vm589_vm5 = vcmask 130048  }
   0x3   :  { %2712 = sst [smem:[#allocation4_spill]] %s2689_s3  ;;  %s2715_s22 = sld [smem:[#allocation3_spill]]  ;;  %v2091_v27 = vpack.c.bf16 %v494_v25, %v493_v24  ;;  %v496_v29 = vld [vmem:[%s2691_s8 + $0x28] sm:$0xff]  ;;  %v497_v31 = vld [vmem:[%s2691_s8 + $0x30] sm:$0xff]  ;;  %v498_v32 = vld [vmem:[%s2691_s8 + $0x38] sm:$0xff]  ;;  %v235_v42 = vshrl.u32 %v234_v39, 7 }
   0x4   :  { %2713 = sst [smem:[#allocation5_spill]] %s2690_s0  ;;  %s2716_s0 = sld [smem:[#allocation4_spill]]  ;;  %v2095_v30 = vpack.c.bf16 %v496_v29, %v495_v28  ;;  %v2099_v33 = vpack.c.bf16 %v498_v32, %v497_v31  ;;  %v1830_v34 = vld [vmem:[%s2692_s10 + $0x1] ss:$0 sm:$0xff]  ;;  %v462_v37 = vld [vmem:[%s2693_s7] sm:$0x1]  ;;  %vm2455_vm6 = vmpackc.low %vm589_vm5, %vm589_vm5 }
   0x5   :  { %s2717_s1 = sld [smem:[#allocation5_spill]]  ;;  %v463_v38 = vadd.f32 0.2, %v462_v37  ;;  %v2426_v44 = vsub.s32 0, %v235_v42  ;;  %v1819_v46 = vld [vmem:[%s2694_s6] ss:$0 sm:$0xff] }
   0x6   :  { %v1820_v52 = vld [vmem:[%s2695_s4] ss:$0 sm:$0xff]  ;;  %s2226_s4 = smov 112   ;;  %v795_v25 = vld [vmem:[%s2697_s9 + $0x1] sm:$0x1]  ;;  %s2229_s7 = smov 48  }
   0x7   :  { %2181 = vrsqrt.f32 %v463_v38  ;;  %v1821_v57 = vld [vmem:[%s2696_s5] ss:$0 sm:$0xff]  ;;  %s2230_s29 = smov 80  }
   0x8   :  { %v2334_v0 = vld [vmem:[%s2714_s20] sm:$0xff] }
   0x9   :  { %v62_v2 = vld [vmem:[%s2715_s22] sm:$0xff]  ;;  %v63_v3 = vld [vmem:[%s2715_s22 + $0x8] sm:$0xff]  ;;  %244 = vxpose.xlu0.b32.start.end [1/1] (short) (narrow) %v2334_v0, 16 }
   0xa   :  { %v2346_v5 = vmul.f32 %v62_v2, %v62_v2  ;;  %v2348_v6 = vmul.f32 %v63_v3, %v63_v3  ;;  %1931 = vmatprep.mubr.msk.f32.mxu0 %vm65_vm0, %v62_v2  ;;  %v365_v8 = vld [vmem:[%s2716_s0] sm:$0xff]  ;;  %v366_v9 = vld [vmem:[%s2716_s0 + $0x8] sm:$0xff]  ;;  %v2069_v12 = vpack.c.bf16 %v63_v3, %v62_v2  ;;  %v367_v14 = vld [vmem:[%s2716_s0 + $0x10] sm:$0xff] }
   0xb   :  { %v2079_v10 = vpack.c.bf16 %v366_v9, %v365_v8  ;;  %v368_v15 = vld [vmem:[%s2716_s0 + $0x18] sm:$0xff]  ;;  %v363_v17 = vld [vmem:[%s2717_s1] sm:$0xff]  ;;  %v364_v19 = vld [vmem:[%s2717_s1 + $0x8] sm:$0xff]  ;;  %s2225_s0 = smov 16  }
   0xc   :  { %v2076_v7 = vpack.c.bf16 %v2348_v6, %v2346_v5  ;;  %2071 = vmatprep.subr.msk.bf16.mxu0 %vm2070_vm2, %v2069_v12  ;;  %v2083_v16 = vpack.c.bf16 %v368_v15, %v367_v14  ;;  %801 = vrot.lane.b32.xlu1 %v1830_v34, %s2225_s0  ;;  %v149_v14 = vsel %vm65_vm0, %v2346_v5, 0.0  ;;  %v152_v15 = vsel %vm65_vm0, %v2348_v6, 0.0 }
   0xd   :  { %2074 = vmatpush3.bf16.xpose.msk.msra.mxu0 %vm2070_vm2, %v2069_v12 }
   0xe   :  { %2078 = vmatpush3.bf16.xpose.msk.msra.mxu1 %vm2070_vm2, %v2076_v7  ;;  %2088 = vmatprep.subr.bf16.mxu0 %v2087_v22 }
   0xf   :  { %1941 = vmatprep.subr.mxu1 %v2334_v0 }
  0x11   :  { %v2182_v43 = vpop.eup %2181 }
  0x12   :  { %v469_v48 = vrot.slane %v2182_v43, %v2426_v44 }
  0x14   :  { %1932 = vmatmul.mubr.msk.f32.vlgmr.msra.gmra.mrb[0].mxu0 %vm65_vm0, %v63_v3 }
  0x15   :  { %1939 = vmatmul.mubr.msk.f32.vlgmr.msra.gmra.mrb[0].mxu1 %vm65_vm0, %v2224_v11  ;;  %2090 = vmatpush3.bf16.msra.mxu0 %v2087_v22  ;;  %v1824_v11 = vld [vmem:[%s2692_s10] ss:$0 sm:$0xff] }
  0x16   :  { %1942 = vmatpush3.msra.mxu1 %v2334_v0  ;;  %2092 = vmatprep.subr.bf16.mxu0 %v2091_v27 }
  0x17   :  { %2080 = vmatprep.subr.bf16.mxu1 %v2079_v10 }
  0x19   :  { %2094 = vmatpush3.bf16.msra.mxu0 %v2091_v27 }
  0x1a   :  { %2096 = vmatprep.subr.bf16.mxu0 %v2095_v30 }
  0x1d   :  { %2098 = vmatpush3.bf16.msra.mxu0 %v2095_v30 }
  0x1e   :  { %2100 = vmatprep.subr.bf16.mxu0 %v2099_v33 }
  0x21   :  { %2102 = vmatpush3.bf16.msra.mxu0 %v2099_v33 }
  0x22   :  { %2111 = vmatprep.subr.bf16.mxu0 %v2221_v1 }
  0x7e   :  { %v802_v61 = vpop.permute.xlu1 %801 }
  0x89   :  { %v260_v13 = vpop.trf.xlu0 }
  0x8a   :  { %1943 = vmatprep.mubr.msk.f32.mxu1 %vm65_vm0, %v260_v13 }
  0x8d   :  { %v261_v18 = vpop.trf.xlu0 }
  0x8e   :  { %1944 = vmatmul.mubr.msk.f32.vlgmr.msra.gmra.mrb[2].mxu1 %vm65_vm0, %v261_v18 }
  0x8f   :  { %2082 = vmatpush3.bf16.msra.mxu1 %v2079_v10  ;;  %1954 = vmatprep.mubr.msk.f32.mxu1 %vm369_vm3, %v363_v17  ;;  %v582_v10 = vld [vmem:[%s2697_s9] sm:$0x1] }
  0x90   :  { %2084 = vmatprep.subr.bf16.mxu1 %v2083_v16 }
  0x93   :  { %2086 = vmatpush3.bf16.msra.mxu1 %v2083_v16 }
  0x94   :  { %2103 = vmatprep.subr.bf16.mxu1 %v2221_v1 }
  0x96   :  { %1955 = vmatmul.mubr.msk.f32.vlgmr.msra.gmra.mrb[4].mxu1 %vm369_vm3, %v364_v19 }
  0x97   :  { %1980 = vmatprep.mubr.msk.f32.mxu1 %vm2222_vm1, %v2223_v4 }
  0xe7   :  { %v2415_v35 = vpop.f32.mrb[0].mxu0 }
  0xe8   :  { %v2390_v23 = vpop.f32.mrb[0].mxu1  ;;  %v2417_v36 = vpop.f32.mrb[1].mxu0  ;;  %v241_v32 = vmul.f32 2.0, %v2415_v35 }
  0xe9   :  { %v1940_v26 = vpop.f32.mrb[1].mxu1  ;;  %v240_v28 = vmul.f32 2.0, %v2417_v36 }
  0xea   :  { %v237_v26 = vrot.slane %v2390_v23, %v2426_v44 }
 0x161   :  { %v2422_v40 = vpop.f32.mrb[2].mxu1 }
 0x162   :  { %v2424_v41 = vpop.f32.mrb[3].mxu1  ;;  %vm360_vm10 = vcmp.gt.f32.partialorder %v2422_v40, 0.5 }
 0x163   :  { %vm359_vm7 = vcmp.gt.f32.partialorder %v2424_v41, 0.5 }
 0x169   :  { %v1956_v45 = vpop.f32.mrb[4].mxu1 }
 0x16a   :  { %v452_v47 = vmax.f32 %v1956_v45, 0.0  ;;  %v442_v49 = vpop.f32.mrb[5].mxu1 }
 0x16b   :  { %v451_v50 = vmax.f32 %v442_v49, 0.0 }
 0x16c   :  { %v461_v51 = vsub.f32 %v452_v47, %v1819_v46 }
 0x16d   :  { %v460_v53 = vsub.f32 %v451_v50, %v1819_v46 }
 0x16e   :  { %v472_v54 = vmul.f32 %v469_v48, %v461_v51 }
 0x16f   :  { %v471_v55 = vmul.f32 %v469_v48, %v460_v53 }
 0x170   :  { %v481_v56 = vmul.f32 %v1820_v52, %v472_v54 }
 0x171   :  { %v480_v58 = vmul.f32 %v1820_v52, %v471_v55 }
 0x172   :  { %v490_v60 = vadd.f32 %v1821_v57, %v481_v56 }
 0x173   :  { %v489_v59 = vadd.f32 %v1821_v57, %v480_v58 }
 0x175   :  { %1973 = vmatprep.mubr.msk.f32.mxu0 %vm499_vm4, %v489_v59 }
 0x176   :  { %1974 = vmatmul.mubr.msk.f32.vlgmr.msra.gmra.mrb[2].mxu0 %vm499_vm4, %v490_v60 }
 0x177   :  { %1994 = vmatprep.mubr.msk.f32.mxu0 %vm2222_vm1, %v2223_v4 }
 0x249   :  { %v2442_v62 = vpop.f32.mrb[2].mxu0 }
 0x24a   :  { %v2444_v63 = vpop.f32.mrb[3].mxu0  ;;  %v805_v9 = vmul.f32 %v2442_v62, %v802_v61  ;;  %v588_v16 = vmul.f32 %v2442_v62, %v1824_v11 }
 0x24b   :  { %v2448_v2 = vpack.i.bf16 %v2442_v62, %v2444_v63  ;;  %v804_v3 = vmul.f32 %v802_v61, %v2444_v63  ;;  %v2104_v7 = vpack.c.bf16 %v2442_v62, %v2444_v63  ;;  %v587_v12 = vmul.f32 %v1824_v11, %v2444_v63 }
 0x24c   :  { %v593_v17 = vsel %vm589_vm5, %v588_v16, 0.0 }
 0x24d   :  { %2167 = vrot.lane.b32.xlu0 %v2448_v2, %s2226_s4  ;;  %808 = vrot.lane.b32.xlu1 %v804_v3, %s2226_s4  ;;  %v590_v13 = vsel %vm589_vm5, %v587_v12, 0.0 }
 0x24e   :  { %2106 = vmatpush3.bf16.xpose.msk.msra.mxu1 %vm2455_vm6, %v2104_v7 }
 0x24f   :  { %2108 = vmatprep.subr.bf16.mxu1 %v2104_v7 }
 0x251   :  { %810 = vrot.lane.b32.xlu1 %v805_v9, %s2226_s4 }
 0x255   :  { %1981 = vmatmul.mubr.msk.f32.vlgmr.msra.gmra.mrb[6].mxu1 %vm589_vm5, %v582_v10 }
 0x256   :  { %2110 = vmatpush3.bf16.msra.mxu1 %v2104_v7 }
 0x26c   :  { %591 = vadd.xlane.f32.xlu0 %v590_v13 }
 0x275   :  { %150 = vadd.xlane.f32.xlu1 %v149_v14 }
 0x279   :  { %153 = vadd.xlane.f32.xlu1 %v152_v15 }
 0x27d   :  { %594 = vadd.xlane.f32.xlu1 %v593_v17 }
 0x2bf   :  { %v2168_v18 = vpop.permute.xlu0 %2167  ;;  %v809_v19 = vpop.permute.xlu1 %808 }
 0x2c0   :  { %v2170_v20 = vunpack.i.h.bf16 %v2168_v18  ;;  %v2169_v21 = vunpack.i.l.bf16 %v2168_v18  ;;  %v814_v22 = vsel %vm589_vm5, %v809_v19, 0.0 }
 0x2c1   :  { %815 = vadd.xlane.f32.xlu1 %v814_v22 }
 0x2c2   :  { %v2479_v24 = vpack.c.bf16 %v2170_v20, %v2169_v21 }
 0x2c3   :  { %v811_v5 = vpop.permute.xlu1 %810 }
 0x2c4   :  { %2114 = vmatpush3.bf16.xpose.msk.msra.mxu0 %vm2455_vm6, %v2479_v24  ;;  %2116 = vmatprep.subr.bf16.mxu1 %v2479_v24  ;;  %v817_v6 = vsel %vm589_vm5, %v811_v5, 0.0 }
 0x2c5   :  { %818 = vadd.xlane.f32.xlu1 %v817_v6 }
 0x2cb   :  { %1995 = vmatmul.mubr.msk.f32.vlgmr.msra.gmra.mrb[4].mxu0 %vm589_vm5, %v795_v25 }
 0x2f9   :  { %v592_v41 = vpop.xlane.xlu0 %591 }
 0x302   :  { %v151_v27 = vpop.xlane.xlu1 %150 }
 0x303   :  { %v238_v29 = vadd.f32 %v237_v26, %v151_v27 }
 0x305   :  { %v242_v30 = vsub.f32 %v238_v29, %v240_v28 }
 0x306   :  { %v154_v31 = vpop.xlane.xlu1 %153 }
 0x307   :  { %vm357_vm8 = vcmp.le.f32.partialorder %v242_v30, 16.0  ;;  %v239_v33 = vadd.f32 %v237_v26, %v154_v31 }
 0x308   :  { %vm2495_vm9 = vmand %vm357_vm8, %vm359_vm7 }
 0x309   :  { %v243_v37 = vsub.f32 %v239_v33, %v241_v32  ;;  %v1836_v32 = vld [vmem:[%s2692_s10 + $0x2] ss:$0 sm:$0xff] }
 0x30a   :  { %v595_v35 = vpop.xlane.xlu1 %594 }
 0x30b   :  { %vm358_vm11 = vcmp.le.f32.partialorder %v243_v37, 16.0 }
 0x30c   :  { %vm2500_vm12 = vmand %vm358_vm11, %vm360_vm10 }
 0x328   :  { %v671_v36 = vpop.f32.mrb[6].mxu1 }
 0x329   :  { %v678_v38 = vrot.slane %v671_v36, %v2426_v44  ;;  %v1982_v39 = vpop.f32.mrb[7].mxu1 }
 0x32b   :  { %v679_v42 = vadd.f32 %v678_v38, %v592_v41  ;;  %v680_v43 = vadd.f32 %v678_v38, %v595_v35 }
 0x32d   :  { %vm681_vm13 = vcmp.gt.f32.partialorder %v679_v42, 0.0  ;;  %v683_v45 = vmul.f32 0.2, %v679_v42  ;;  %vm682_vm14 = vcmp.gt.f32.partialorder %v680_v43, 0.0  ;;  %v684_v46 = vmul.f32 0.2, %v680_v43 }
 0x32f   :  { %v685_v47 = vsel %vm681_vm13, %v679_v42, %v683_v45  ;;  %v686_v48 = vsel %vm682_vm14, %v680_v43, %v684_v46 }
 0x330   :  { %v687_v40 = vsel %vm2495_vm9, %v685_v47, -1e+30  ;;  %v688_v50 = vsel %vm2500_vm12, %v686_v48, -1e+30 }
 0x331   :  { %v689_v49 = vsel %vm589_vm5, %v687_v40, -inf  ;;  %v692_v51 = vsel %vm589_vm5, %v688_v50, -inf }
 0x332   :  { %690 = vmax.xlane.f32.xlu1 %v689_v49 }
 0x336   :  { %693 = vmax.xlane.f32.xlu1 %v692_v51 }
 0x34e   :  { %v816_v52 = vpop.xlane.xlu1 %815 }
 0x352   :  { %v819_v56 = vpop.xlane.xlu1 %818 }
 0x39e   :  { %v897_v53 = vpop.f32.mrb[4].mxu0 }
 0x39f   :  { %v904_v54 = vrot.slane %v897_v53, %v2426_v44  ;;  %v1996_v55 = vpop.f32.mrb[5].mxu0 }
 0x3a1   :  { %v905_v57 = vadd.f32 %v904_v54, %v816_v52  ;;  %v906_v58 = vadd.f32 %v904_v54, %v819_v56 }
 0x3a3   :  { %vm907_vm15 = vcmp.gt.f32.partialorder %v905_v57, 0.0  ;;  %v909_v59 = vmul.f32 0.2, %v905_v57  ;;  %vm908_vm0 = vcmp.gt.f32.partialorder %v906_v58, 0.0  ;;  %v910_v60 = vmul.f32 0.2, %v906_v58 }
 0x3a5   :  { %v911_v61 = vsel %vm907_vm15, %v905_v57, %v909_v59  ;;  %v912_v3 = vsel %vm908_vm0, %v906_v58, %v910_v60  ;;  %v1023_v57 = vld [vmem:[%s2697_s9 + $0x2] sm:$0x1] }
 0x3a6   :  { %v913_v7 = vsel %vm2495_vm9, %v911_v61, -1e+30  ;;  %v914_v10 = vsel %vm2500_vm12, %v912_v3, -1e+30 }
 0x3a7   :  { %v915_v9 = vsel %vm589_vm5, %v913_v7, -inf  ;;  %v918_v11 = vsel %vm589_vm5, %v914_v10, -inf }
 0x3a8   :  { %916 = vmax.xlane.f32.xlu1 %v915_v9 }
 0x3ac   :  { %919 = vmax.xlane.f32.xlu1 %v918_v11 }
 0x3bf   :  { %v691_v12 = vpop.xlane.xlu1 %690 }
 0x3c0   :  { %v695_v13 = vsub.f32 %v687_v40, %v691_v12 }
 0x3c2   :  { %v697_v14 = vmul.f32 1.442695, %v695_v13 }
 0x3c3   :  { %v694_v15 = vpop.xlane.xlu1 %693 }
 0x3c4   :  { %2183 = vpow2.f32 %v697_v14  ;;  %v696_v16 = vsub.f32 %v688_v50, %v694_v15 }
 0x3c6   :  { %v699_v17 = vmul.f32 1.442695, %v696_v16 }
 0x3c8   :  { %2185 = vpow2.f32 %v699_v17 }
 0x3ce   :  { %v2184_v18 = vpop.eup %2183 }
 0x3cf   :  { %v701_v19 = vsel %vm589_vm5, %v2184_v18, 0.0 }
 0x3d0   :  { %702 = vadd.xlane.f32.xlu0 %v701_v19 }
 0x3d2   :  { %v2186_v20 = vpop.eup %2185 }
 0x3d3   :  { %v704_v21 = vsel %vm589_vm5, %v2186_v20, 0.0 }
 0x3d4   :  { %705 = vadd.xlane.f32.xlu1 %v704_v21 }
 0x435   :  { %v917_v22 = vpop.xlane.xlu1 %916 }
 0x436   :  { %v921_v5 = vsub.f32 %v913_v7, %v917_v22 }
 0x438   :  { %v923_v6 = vmul.f32 1.442695, %v921_v5 }
 0x439   :  { %v920_v25 = vpop.xlane.xlu1 %919 }
 0x43a   :  { %2187 = vpow2.f32 %v923_v6  ;;  %v922_v26 = vsub.f32 %v914_v10, %v920_v25 }
 0x43c   :  { %v925_v27 = vmul.f32 1.442695, %v922_v26 }
 0x43e   :  { %2189 = vpow2.f32 %v925_v27 }
 0x444   :  { %v2188_v28 = vpop.eup %2187 }
 0x445   :  { %v927_v29 = vsel %vm589_vm5, %v2188_v28, 0.0 }
 0x446   :  { %928 = vadd.xlane.f32.xlu0 %v927_v29 }
 0x448   :  { %v2190_v30 = vpop.eup %2189 }
 0x449   :  { %v930_v31 = vsel %vm589_vm5, %v2190_v30, 0.0 }
 0x44a   :  { %931 = vadd.xlane.f32.xlu1 %v930_v31 }
 0x45b   :  { %1029 = vrot.lane.b32.xlu1 %v1836_v32, %s2227_s24 }
 0x45c   :  { %2172 = vrot.lane.b32.xlu0 %v2448_v2, %s2228_s25 }
 0x45d   :  { %v703_v33 = vpop.xlane.xlu0 %702 }
 0x45e   :  { %v707_v37 = vadd.f32 1e-16, %v703_v33 }
 0x460   :  { %2191 = vrcp.f32 %v707_v37 }
 0x461   :  { %v706_v36 = vpop.xlane.xlu1 %705 }
 0x462   :  { %v708_v38 = vadd.f32 1e-16, %v706_v36 }
 0x464   :  { %2193 = vrcp.f32 %v708_v38  ;;  %v1842_v38 = vld [vmem:[%s2692_s10 + $0x3] ss:$0 sm:$0xff] }
 0x46a   :  { %v2192_v39 = vpop.eup %2191 }
 0x46b   :  { %v711_v41 = vmul.f32 %v2192_v39, %v2184_v18 }
 0x46d   :  { %1987 = vmatprep.mubr.msk.f32.mxu1 %vm589_vm5, %v711_v41 }
 0x46e   :  { %v2194_v35 = vpop.eup %2193 }
 0x46f   :  { %v712_v42 = vmul.f32 %v2194_v35, %v2186_v20 }
 0x471   :  { %1988 = vmatmul.mubr.msk.f32.vlgmr.msra.gmra.mrb[8].mxu1 %vm589_vm5, %v712_v42 }
 0x472   :  { %2118 = vmatpush3.bf16.msra.mxu1 %v2479_v24 }
 0x473   :  { %2119 = vmatprep.subr.bf16.mxu1 %v2221_v1 }
 0x4d3   :  { %v929_v43 = vpop.xlane.xlu0 %928 }
 0x4d4   :  { %v933_v45 = vadd.f32 1e-16, %v929_v43 }
 0x4d6   :  { %2195 = vrcp.f32 %v933_v45 }
 0x4d7   :  { %v2173_v46 = vpop.permute.xlu0 %2172  ;;  %v932_v47 = vpop.xlane.xlu1 %931 }
 0x4d8   :  { %v2175_v48 = vunpack.i.h.bf16 %v2173_v46  ;;  %v2174_v40 = vunpack.i.l.bf16 %v2173_v46  ;;  %v934_v49 = vadd.f32 1e-16, %v932_v47 }
 0x4da   :  { %v2120_v50 = vpack.c.bf16 %v2175_v48, %v2174_v40  ;;  %2197 = vrcp.f32 %v934_v49 }
 0x4db   :  { %v1030_v51 = vpop.permute.xlu1 %1029 }
 0x4dc   :  { %v1032_v52 = vmul.f32 %v1030_v51, %v2444_v63  ;;  %2124 = vmatprep.subr.bf16.mxu0 %v2120_v50  ;;  %v1033_v53 = vmul.f32 %v2442_v62, %v1030_v51 }
 0x4dd   :  { %2126 = vmatpush3.bf16.msra.mxu0 %v2120_v50 }
 0x4de   :  { %1036 = vrot.lane.b32.xlu1 %v1032_v52, %s2228_s25  ;;  %2127 = vmatprep.subr.bf16.mxu0 %v2221_v1 }
 0x4e0   :  { %v2196_v24 = vpop.eup %2195 }
 0x4e1   :  { %v937_v54 = vmul.f32 %v2196_v24, %v2188_v28 }
 0x4e2   :  { %1038 = vrot.lane.b32.xlu1 %v1033_v53, %s2228_s25 }
 0x4e3   :  { %2001 = vmatprep.mubr.msk.f32.mxu1 %vm589_vm5, %v937_v54 }
 0x4e4   :  { %v2198_v55 = vpop.eup %2197 }
 0x4e5   :  { %v938_v56 = vmul.f32 %v2198_v55, %v2190_v30 }
 0x4e7   :  { %2002 = vmatmul.mubr.msk.f32.vlgmr.msra.gmra.mrb[10].mxu1 %vm589_vm5, %v938_v56 }
 0x4e8   :  { %2122 = vmatpush3.bf16.xpose.msk.msra.mxu1 %vm2455_vm6, %v2120_v50  ;;  %2008 = vmatprep.mubr.msk.f32.mxu1 %vm2222_vm1, %v2223_v4 }
 0x4ef   :  { %2009 = vmatmul.mubr.msk.f32.vlgmr.msra.gmra.mrb[12].mxu1 %vm589_vm5, %v1023_v57 }
 0x544   :  { %v2547_v58 = vpop.f32.mrb[8].mxu1 }
 0x545   :  { %v2549_v59 = vpop.f32.mrb[9].mxu1 }
 0x550   :  { %v1037_v60 = vpop.permute.xlu1 %1036 }
 0x551   :  { %v1042_v61 = vsel %vm589_vm5, %v1037_v60, 0.0 }
 0x552   :  { %1043 = vadd.xlane.f32.xlu0 %v1042_v61 }
 0x554   :  { %v1039_v3 = vpop.permute.xlu1 %1038 }
 0x555   :  { %v1045_v7 = vsel %vm589_vm5, %v1039_v3, 0.0 }
 0x556   :  { %1046 = vadd.xlane.f32.xlu1 %v1045_v7 }
 0x5ba   :  { %v2553_v9 = vpop.f32.mrb[10].mxu1 }
 0x5bb   :  { %v2555_v10 = vpop.f32.mrb[11].mxu1 }
 0x5c2   :  { %v1125_v11 = vpop.f32.mrb[12].mxu1 }
 0x5c3   :  { %v2010_v12 = vpop.f32.mrb[13].mxu1  ;;  %v1132_v13 = vrot.slane %v1125_v11, %v2426_v44 }
 0x5df   :  { %v1044_v14 = vpop.xlane.xlu0 %1043 }
 0x5e0   :  { %v1133_v15 = vadd.f32 %v1132_v13, %v1044_v14 }
 0x5e2   :  { %v1137_v16 = vmul.f32 0.2, %v1133_v15  ;;  %vm1135_vm2 = vcmp.gt.f32.partialorder %v1133_v15, 0.0 }
 0x5e3   :  { %v1047_v17 = vpop.xlane.xlu1 %1046 }
 0x5e4   :  { %v1134_v18 = vadd.f32 %v1132_v13, %v1047_v17  ;;  %v1139_v19 = vsel %vm1135_vm2, %v1133_v15, %v1137_v16 }
 0x5e5   :  { %v1141_v20 = vsel %vm2495_vm9, %v1139_v19, -1e+30 }
 0x5e6   :  { %v1138_v21 = vmul.f32 0.2, %v1134_v18  ;;  %v1143_v22 = vsel %vm589_vm5, %v1141_v20, -inf  ;;  %vm1136_vm7 = vcmp.gt.f32.partialorder %v1134_v18, 0.0 }
 0x5e7   :  { %1144 = vmax.xlane.f32.xlu0 %v1143_v22 }
 0x5e8   :  { %v1140_v5 = vsel %vm1136_vm7, %v1134_v18, %v1138_v21 }
 0x5e9   :  { %v1142_v6 = vsel %vm2500_vm12, %v1140_v5, -1e+30 }
 0x5ea   :  { %v1146_v25 = vsel %vm589_vm5, %v1142_v6, -inf }
 0x5eb   :  { %1147 = vmax.xlane.f32.xlu0 %v1146_v25 }
 0x674   :  { %v1145_v26 = vpop.xlane.xlu0 %1144 }
 0x675   :  { %v1149_v27 = vsub.f32 %v1141_v20, %v1145_v26 }
 0x677   :  { %v1151_v28 = vmul.f32 1.442695, %v1149_v27 }
 0x678   :  { %v1148_v29 = vpop.xlane.xlu0 %1147 }
 0x679   :  { %2199 = vpow2.f32 %v1151_v28  ;;  %v1150_v30 = vsub.f32 %v1142_v6, %v1148_v29 }
 0x67b   :  { %v1153_v31 = vmul.f32 1.442695, %v1150_v30 }
 0x67d   :  { %2201 = vpow2.f32 %v1153_v31 }
 0x683   :  { %v2200_v32 = vpop.eup %2199 }
 0x684   :  { %v1155_v33 = vsel %vm589_vm5, %v2200_v32, 0.0 }
 0x685   :  { %1156 = vadd.xlane.f32.xlu0 %v1155_v33 }
 0x687   :  { %v2202_v37 = vpop.eup %2201 }
 0x688   :  { %v1158_v36 = vsel %vm589_vm5, %v2202_v37, 0.0 }
 0x689   :  { %1159 = vadd.xlane.f32.xlu1 %v1158_v36 }
 0x69a   :  { %1257 = vrot.lane.b32.xlu1 %v1842_v38, %s2229_s7  ;;  %v1520_v38 = vsel %vm589_vm5, %v2334_v0, 0.0 }
 0x69b   :  { %2177 = vrot.lane.b32.xlu0 %v2448_v2, %s2230_s29 }
 0x712   :  { %v1157_v39 = vpop.xlane.xlu0 %1156 }
 0x713   :  { %v1161_v41 = vadd.f32 1e-16, %v1157_v39  ;;  %v1603_v39 = vld [vmem:[%s2698_s12] sm:$0xff] }
 0x715   :  { %2203 = vrcp.f32 %v1161_v41  ;;  %v1604_v41 = vld [vmem:[%s2698_s12 + $0x8] sm:$0xff] }
 0x716   :  { %v1160_v35 = vpop.xlane.xlu1 %1159  ;;  %v2178_v42 = vpop.permute.xlu0 %2177 }
 0x717   :  { %v1162_v43 = vadd.f32 1e-16, %v1160_v35  ;;  %v2180_v45 = vunpack.i.h.bf16 %v2178_v42  ;;  %v2179_v46 = vunpack.i.l.bf16 %v2178_v42  ;;  %v1605_v35 = vld [vmem:[%s2698_s12 + $0x10] sm:$0xff]  ;;  %v2139_v42 = vpack.c.bf16 %v1604_v41, %v1603_v39 }
 0x719   :  { %2205 = vrcp.f32 %v1162_v43  ;;  %v2128_v47 = vpack.c.bf16 %v2180_v45, %v2179_v46  ;;  %v1606_v43 = vld [vmem:[%s2698_s12 + $0x18] sm:$0xff]  ;;  %v1607_v46 = vld [vmem:[%s2698_s12 + $0x20] sm:$0xff] }
 0x71a   :  { %v1258_v48 = vpop.permute.xlu1 %1257  ;;  %v2142_v45 = vpack.c.bf16 %v1606_v43, %v1605_v35 }
 0x71b   :  { %v1260_v40 = vmul.f32 %v1258_v48, %v2444_v63  ;;  %2132 = vmatprep.subr.bf16.mxu1 %v2128_v47  ;;  %v1261_v2 = vmul.f32 %v2442_v62, %v1258_v48  ;;  %v1251_v62 = vld [vmem:[%s2697_s9 + $0x3] sm:$0x1] }
 0x71c   :  { %2134 = vmatpush3.bf16.msra.mxu1 %v2128_v47 }
 0x71d   :  { %1264 = vrot.lane.b32.xlu1 %v1260_v40, %s2230_s29  ;;  %2135 = vmatprep.subr.bf16.mxu1 %v2221_v1 }
 0x71f   :  { %v2204_v49 = vpop.eup %2203 }
 0x720   :  { %v1165_v50 = vmul.f32 %v2204_v49, %v2200_v32 }
 0x721   :  { %1266 = vrot.lane.b32.xlu1 %v1261_v2, %s2230_s29 }
 0x722   :  { %2015 = vmatprep.mubr.msk.f32.mxu0 %vm589_vm5, %v1165_v50 }
 0x723   :  { %v2206_v51 = vpop.eup %2205 }
 0x724   :  { %v1166_v52 = vmul.f32 %v2206_v51, %v2202_v37 }
 0x726   :  { %2016 = vmatmul.mubr.msk.f32.vlgmr.msra.gmra.mrb[6].mxu0 %vm589_vm5, %v1166_v52  ;;  %v1848_v52 = vld [vmem:[%s2699_s11] ss:$0 sm:$0xff] }
 0x727   :  { %2130 = vmatpush3.bf16.xpose.msk.msra.mxu0 %vm2455_vm6, %v2128_v47  ;;  %2022 = vmatprep.mubr.msk.f32.mxu0 %vm2222_vm1, %v2223_v4  ;;  %v1608_v47 = vld [vmem:[%s2698_s12 + $0x28] sm:$0xff] }
 0x728   :  { %2138 = vmatprep.subr.bf16.mxu0 %v2221_v1  ;;  %v2145_v48 = vpack.c.bf16 %v1608_v47, %v1607_v46 }
 0x72e   :  { %2023 = vmatmul.mubr.msk.f32.vlgmr.msra.gmra.mrb[8].mxu0 %vm589_vm5, %v1251_v62 }
 0x72f   :  { %2055 = vmatprep.mubr.msk.f32.mxu0 %vm2222_vm1, %v2223_v4  ;;  %2140 = vmatpush3.bf16.msra.mxu0 %v2139_v42 }
 0x730   :  { %2141 = vmatprep.subr.bf16.mxu0 %v2221_v1 }
 0x733   :  { %2143 = vmatpush3.bf16.msra.mxu0 %v2142_v45 }
 0x734   :  { %2144 = vmatprep.subr.bf16.mxu0 %v2221_v1 }
 0x737   :  { %2146 = vmatpush3.bf16.msra.mxu0 %v2145_v48 }
 0x738   :  { %2147 = vmatprep.subr.bf16.mxu0 %v2221_v1 }
 0x78f   :  { %v1265_v63 = vpop.permute.xlu1 %1264 }
 0x790   :  { %v1270_v24 = vsel %vm589_vm5, %v1265_v63, 0.0 }
 0x791   :  { %1271 = vadd.xlane.f32.xlu0 %v1270_v24 }
 0x793   :  { %v1267_v8 = vpop.permute.xlu1 %1266 }
 0x794   :  { %v1273_v53 = vsel %vm589_vm5, %v1267_v8, 0.0 }
 0x795   :  { %1274 = vadd.xlane.f32.xlu1 %v1273_v53 }
 0x7f9   :  { %v2017_v54 = vpop.f32.mrb[6].mxu0 }
 0x7fa   :  { %v1241_v55 = vpop.f32.mrb[7].mxu0 }
 0x801   :  { %v1353_v56 = vpop.f32.mrb[8].mxu0 }
 0x802   :  { %v2024_v57 = vpop.f32.mrb[9].mxu0  ;;  %v1360_v60 = vrot.slane %v1353_v56, %v2426_v44 }
 0x81e   :  { %v1272_v61 = vpop.xlane.xlu0 %1271 }
 0x81f   :  { %v1361_v3 = vadd.f32 %v1360_v60, %v1272_v61 }
 0x821   :  { %v1365_v7 = vmul.f32 0.2, %v1361_v3  ;;  %vm1363_vm6 = vcmp.gt.f32.partialorder %v1361_v3, 0.0 }
 0x822   :  { %v1275_v11 = vpop.xlane.xlu1 %1274 }
 0x823   :  { %v1362_v12 = vadd.f32 %v1360_v60, %v1275_v11  ;;  %v1367_v13 = vsel %vm1363_vm6, %v1361_v3, %v1365_v7  ;;  %v1610_v3 = vld [vmem:[%s2698_s12 + $0x38] sm:$0xff] }
 0x824   :  { %v1369_v14 = vsel %vm2495_vm9, %v1367_v13, -1e+30  ;;  %vm1506_vm9 = vcmask 392192  }
 0x825   :  { %v1366_v15 = vmul.f32 0.2, %v1362_v12  ;;  %v1371_v16 = vsel %vm589_vm5, %v1369_v14, -inf  ;;  %vm1364_vm8 = vcmp.gt.f32.partialorder %v1362_v12, 0.0 }
 0x826   :  { %1372 = vmax.xlane.f32.xlu0 %v1371_v16 }
 0x827   :  { %v1368_v17 = vsel %vm1364_vm8, %v1362_v12, %v1366_v15 }
 0x828   :  { %v1370_v18 = vsel %vm2500_vm12, %v1368_v17, -1e+30 }
 0x829   :  { %v1374_v19 = vsel %vm589_vm5, %v1370_v18, -inf }
 0x82a   :  { %1375 = vmax.xlane.f32.xlu0 %v1374_v19  ;;  %v1720_v19 = vld [vmem:[%s2700_s17 + $0x8] sm:$0xff] }
 0x8b3   :  { %v1373_v20 = vpop.xlane.xlu0 %1372 }
 0x8b4   :  { %v1377_v21 = vsub.f32 %v1369_v14, %v1373_v20 }
 0x8b6   :  { %v1379_v22 = vmul.f32 1.442695, %v1377_v21  ;;  %v1721_v21 = vld [vmem:[%s2700_s17 + $0x10] sm:$0xff] }
 0x8b7   :  { %v1376_v5 = vpop.xlane.xlu0 %1375 }
 0x8b8   :  { %2207 = vpow2.f32 %v1379_v22  ;;  %v1378_v6 = vsub.f32 %v1370_v18, %v1376_v5  ;;  %v1719_v18 = vld [vmem:[%s2700_s17] sm:$0xff]  ;;  %v1722_v22 = vld [vmem:[%s2700_s17 + $0x18] sm:$0xff] }
 0x8b9   :  { %v2151_v20 = vpack.c.bf16 %v1720_v19, %v1719_v18  ;;  %v2154_v5 = vpack.c.bf16 %v1722_v22, %v1721_v21 }
 0x8ba   :  { %v1381_v34 = vmul.f32 1.442695, %v1378_v6  ;;  %v1693_v6 = vld [vmem:[%s2701_s16] sm:$0x1] }
 0x8bc   :  { %2209 = vpow2.f32 %v1381_v34  ;;  %v1694_v34 = vadd.f32 0.2, %v1693_v6 }
 0x8c2   :  { %v2208_v25 = vpop.eup %2207 }
 0x8c3   :  { %v1383_v26 = vsel %vm589_vm5, %v2208_v25, 0.0 }
 0x8c4   :  { %1384 = vadd.xlane.f32.xlu0 %v1383_v26 }
 0x8c6   :  { %v2210_v27 = vpop.eup %2209 }
 0x8c7   :  { %v1386_v28 = vsel %vm589_vm5, %v2210_v27, 0.0 }
 0x8c8   :  { %1387 = vadd.xlane.f32.xlu1 %v1386_v28 }
 0x8d9   :  { %1482 = vrot.lane.b32.xlu1 %v2553_v9, %s2225_s0 }
 0x8da   :  { %1480 = vrot.lane.b32.xlu0 %v2555_v10, %s2225_s0 }
 0x8dd   :  { %1488 = vrot.lane.b32.xlu1 %v1241_v55, %s2227_s24 }
 0x8e1   :  { %1490 = vrot.lane.b32.xlu1 %v2017_v54, %s2227_s24 }
 0x951   :  { %v1385_v23 = vpop.xlane.xlu0 %1384 }
 0x952   :  { %v1389_v29 = vadd.f32 1e-16, %v1385_v23 }
 0x954   :  { %2211 = vrcp.f32 %v1389_v29 }
 0x955   :  { %v1388_v30 = vpop.xlane.xlu1 %1387  ;;  %v1481_v50 = vpop.permute.xlu0 %1480 }
 0x956   :  { %v1390_v31 = vadd.f32 1e-16, %v1388_v30  ;;  %v1502_v62 = vsel %vm589_vm5, %v2549_v59, %v1481_v50  ;;  %v1609_v59 = vld [vmem:[%s2698_s12 + $0x30] sm:$0xff]  ;;  %v1852_v30 = vld [vmem:[%s2703_s13] ss:$0 sm:$0xff] }
 0x957   :  { %v2148_v7 = vpack.c.bf16 %v1610_v3, %v1609_v59 }
 0x958   :  { %2213 = vrcp.f32 %v1390_v31 }
 0x959   :  { %v1483_v40 = vpop.permute.xlu1 %1482  ;;  %2149 = vmatpush3.bf16.msra.mxu0 %v2148_v7 }
 0x95a   :  { %v1503_v51 = vsel %vm589_vm5, %v2547_v58, %v1483_v40 }
 0x95d   :  { %v1489_v49 = vpop.permute.xlu1 %1488 }
 0x95e   :  { %v2212_v32 = vpop.eup %2211  ;;  %v1504_v8 = vsel %vm369_vm3, %v1502_v62, %v1489_v49 }
 0x95f   :  { %v1393_v33 = vmul.f32 %v2212_v32, %v2208_v25  ;;  %v1853_v32 = vld [vmem:[%s2704_s14] ss:$0 sm:$0xff] }
 0x961   :  { %2029 = vmatprep.mubr.msk.f32.mxu1 %vm589_vm5, %v1393_v33  ;;  %v1491_v2 = vpop.permute.xlu1 %1490 }
 0x962   :  { %v2214_v37 = vpop.eup %2213  ;;  %v1505_v63 = vsel %vm369_vm3, %v1503_v51, %v1491_v2 }
 0x963   :  { %v1394_v36 = vmul.f32 %v2214_v37, %v2210_v27 }
 0x965   :  { %2030 = vmatmul.mubr.msk.f32.vlgmr.msra.gmra.mrb[14].mxu1 %vm589_vm5, %v1394_v36  ;;  %v1854_v36 = vld [vmem:[%s2705_s18] ss:$0 sm:$0xff] }
 0x966   :  { %2036 = vmatprep.mubr.msk.f32.mxu1 %vm2222_vm1, %v2223_v4 }
 0xa38   :  { %v2031_v9 = vpop.f32.mrb[14].mxu1 }
 0xa39   :  { %1498 = vrot.lane.b32.xlu1 %v2031_v9, %s2229_s7  ;;  %v1469_v10 = vpop.f32.mrb[15].mxu1 }
 0xa3a   :  { %1496 = vrot.lane.b32.xlu0 %v1469_v10, %s2229_s7 }
 0xa59   :  { %1521 = vadd.xlane.f32.xlu0 %v1520_v38 }
 0xaab   :  { %v1499_v24 = vpop.permute.xlu1 %1498 }
 0xaac   :  { %v1508_v53 = vsel %vm1506_vm9, %v1505_v63, %v1499_v24  ;;  %v1497_v54 = vpop.permute.xlu0 %1496 }
 0xaad   :  { %v1517_v55 = vadd.f32 %v1848_v52, %v1508_v53  ;;  %v1507_v56 = vsel %vm1506_vm9, %v1504_v8, %v1497_v54 }
 0xaae   :  { %v1516_v57 = vadd.f32 %v1848_v52, %v1507_v56 }
 0xaaf   :  { %v1519_v60 = vmax.f32 %v1517_v55, 0.0 }
 0xab0   :  { %v1518_v61 = vmax.f32 %v1516_v57, 0.0 }
 0xab2   :  { %v2136_v58 = vpack.c.bf16 %v1519_v60, %v1518_v61 }
 0xab4   :  { %2137 = vmatpush3.bf16.msra.mxu1 %v2136_v58 }
 0xab5   :  { %2150 = vmatprep.subr.bf16.mxu1 %v2221_v1 }
 0xab7   :  { %2037 = vmatmul.mubr.msk.f32.vlgmr.msra.gmra.mrb[16].mxu1 %vm589_vm5, %v2334_v0 }
 0xab8   :  { %2066 = vmatprep.mubr.msk.f32.mxu1 %vm2222_vm1, %v2223_v4  ;;  %2152 = vmatpush3.bf16.msra.mxu1 %v2151_v20 }
 0xab9   :  { %2153 = vmatprep.subr.bf16.mxu1 %v2221_v1  ;;  %v1851_v1 = vld [vmem:[%s2702_s15] ss:$0 sm:$0xff] }
 0xabc   :  { %2155 = vmatpush3.bf16.msra.mxu1 %v2154_v5 }
 0xae6   :  { %v1522_v11 = vpop.xlane.xlu0 %1521 }
 0xae7   :  { %v1523_v12 = vmax.f32 %v1522_v11, 1.0  ;;  %vm1524_vm5 = vcmp.gt.f32.partialorder %v1522_v11, 0.5 }
 0xae9   :  { %2215 = vrsqrt.f32 %v1523_v12 }
 0xaea   :  { %2217 = vrcp.f32 %v1523_v12 }
 0xaeb   :  { %2219 = vrsqrt.f32 %v1694_v34 }
 0xaf3   :  { %v2216_v13 = vpop.eup %2215 }
 0xaf4   :  { %v2218_v14 = vpop.eup %2217 }
 0xaf5   :  { %v1527_v0 = vmul.f32 %v2218_v14, %v2216_v13  ;;  %v2220_v25 = vpop.eup %2219 }
 0xaf6   :  { %v1700_v28 = vrot.slane %v2220_v25, %v2426_v44 }
 0xaf7   :  { %v1528_v15 = vsel %vm1524_vm5, %v1527_v0, 0.0 }
 0xb8a   :  { %v1598_v4 = vpop.f32.mrb[16].mxu1 }
 0xb8b   :  { %v1602_v16 = vmul.f32 %v1598_v4, %v1528_v15  ;;  %v2038_v17 = vpop.f32.mrb[17].mxu1 }
 0xb8d   :  { %2056 = vmatmul.mubr.msk.f32.vlgmr.msra.gmra.mrb[10].mxu0 %vm499_vm4, %v1602_v16 }
 0xc60   :  { %v1680_v26 = vpop.f32.mrb[10].mxu0 }
 0xc61   :  { %v1684_v27 = vmax.f32 %v1680_v26, 0.0  ;;  %v2057_v23 = vpop.f32.mrb[11].mxu0 }
 0xc63   :  { %v1692_v29 = vsub.f32 %v1684_v27, %v1851_v1 }
 0xc65   :  { %v1702_v31 = vmul.f32 %v1700_v28, %v1692_v29 }
 0xc67   :  { %v1710_v33 = vmul.f32 %v1852_v30, %v1702_v31 }
 0xc69   :  { %v1718_v37 = vadd.f32 %v1853_v32, %v1710_v33 }
 0xc6b   :  { %2067 = vmatmul.mubr.msk.f32.vlgmr.msra.gmra.mrb[18].mxu1 %vm369_vm3, %v1718_v37 }
 0xd3e   :  { %v1799_v44 = vpop.f32.mrb[18].mxu1 }
 0xd3f   :  { %v1800_v9 = vadd.f32 %v1854_v36, %v1799_v44  ;;  %v2068_v10 = vpop.f32.mrb[19].mxu1 }
 0xd41   :  { %1803 = vst [vmem:[%s2706_s19] sm:$0xff] %v1800_v9 }

</bundles_post_ra>
